<compile_context>
chip_gen: v5e
topology: v5e:2x2
jax: 0.10.0
libtpu: 0.0.40
codegen_flags: <defaults>
</compile_context>

<pallas_src>
import numpy as np

import jax
import jax.numpy as jnp
from jax.experimental import pallas as pl
from jax.experimental.pallas import tpu as pltpu

LANE = 128


def _make_kernel(n_valid, eps, beta, block_rows, grid_n, tail_rem):
    beta2 = float(beta) ** 2
    eps = float(eps)
    n_valid_f = float(n_valid)
    block_elems = block_rows * LANE
    needs_tail_mask = tail_rem != block_elems
    last = grid_n - 1

    def loss_from_sums(sum_bce, sum_p, sum_g, tp):
        bce_mean = sum_bce / n_valid_f
        fp = sum_p - tp
        fn = sum_g - tp
        score = ((1.0 + beta2) * tp + eps) / (
            (1.0 + beta2) * tp + beta2 * fn + fp + eps)
        return jnp.full((1, 1), (1.0 - score) + bce_mean, dtype=jnp.float32)

    def apply_tail_mask(vals):
        # Block-local indices against a static remainder: no int32 overflow
        # regardless of total tensor size.
        row = jax.lax.broadcasted_iota(jnp.int32, (block_rows, LANE), 0)
        lane = jax.lax.broadcasted_iota(jnp.int32, (block_rows, LANE), 1)
        valid = (row * LANE + lane) < tail_rem
        return [jnp.where(valid, v, 0.0) for v in vals]

    def kernel(x_ref, g_ref, out_ref, acc_ref):
        i = pl.program_id(0)

        x = x_ref[...].astype(jnp.float32)   # logits
        g = g_ref[...].astype(jnp.float32)   # targets

        # Numerically stable BCE-with-logits, reusing e = exp(-|x|) for sigmoid:
        #   bce = max(x, 0) - x*g + log1p(exp(-|x|))
        #   sigmoid(x) = 1/(1+e)  if x >= 0,   e/(1+e)  if x < 0
        e = jnp.exp(-jnp.abs(x))
        bce = jnp.maximum(x, 0.0) - x * g + jnp.log1p(e)
        inv_1pe = 1.0 / (1.0 + e)
        p = jnp.where(x >= 0.0, inv_1pe, e * inv_1pe)

        if grid_n == 1:
            # Whole tensor in a single block: reduce directly, no accumulator.
            if needs_tail_mask:
                bce, p, g = apply_tail_mask([bce, p, g])
            out_ref[...] = loss_from_sums(jnp.sum(bce), jnp.sum(p),
                                          jnp.sum(g), jnp.sum(p * g))
            return

        @pl.when(i == 0)
        def _init():
            acc_ref[...] = jnp.zeros_like(acc_ref)

        def reduce8(q):
            # (block_rows, LANE) -> (8, LANE): collapse whole-vreg chunks with
            # pure VPU adds; avoids full-tile accumulator load/store traffic.
            return jnp.sum(q.reshape(block_rows // 8, 8, LANE), axis=0)

        def accumulate(b_, p_, g_):
            acc_ref[0] += reduce8(b_)
            acc_ref[1] += reduce8(p_)
            acc_ref[2] += reduce8(g_)
            acc_ref[3] += reduce8(p_ * g_)

        if needs_tail_mask:
            # Mask work only on the (partial) final block; full blocks pay nothing.
            @pl.when(i != last)
            def _full_blocks():
                accumulate(bce, p, g)

            @pl.when(i == last)
            def _tail_block():
                mb, mp, mg = apply_tail_mask([bce, p, g])
                accumulate(mb, mp, mg)
        else:
            accumulate(bce, p, g)

        @pl.when(i == last)
        def _finalize():
            out_ref[...] = loss_from_sums(jnp.sum(acc_ref[0]),
                                          jnp.sum(acc_ref[1]),
                                          jnp.sum(acc_ref[2]),
                                          jnp.sum(acc_ref[3]))

    return kernel


def bce_dice_loss(y_pr, y_gt, eps=1e-7, beta=1.0):
    """Pallas implementation of BCEDiceLoss.forward
    (activation='sigmoid', threshold=None, ignore_channels=None)."""
    assert y_pr.shape == y_gt.shape
    n = int(np.prod(y_pr.shape))
    rows = -(-n // LANE)  # cdiv

    x = y_pr.reshape(-1)
    g = y_gt.reshape(-1)
    if rows * LANE != n:
        # Pad only to the next lane multiple (< 128 elements); padded elements
        # are excluded in-kernel by the tail mask.
        pad = rows * LANE - n
        x = jnp.pad(x, (0, pad))
        g = jnp.pad(g, (0, pad))
    x = x.reshape(rows, LANE)
    g = g.reshape(rows, LANE)

    # dtype-aware tile size: keep per-step HBM bytes roughly constant.
    itemsize = max(np.dtype(y_pr.dtype).itemsize, np.dtype(y_gt.dtype).itemsize)
    max_rows = 8192 if itemsize <= 2 else 4096   # multiples of 16 (and 8)
    if rows <= max_rows:
        block_rows = rows          # full-extent block: exempt from (8,128) rule
        grid_n = 1
    else:
        block_rows = max_rows
        grid_n = -(-rows // block_rows)
    tail_rem = n - (grid_n - 1) * block_rows * LANE  # valid elems in last block

    # Right-size scoped VMEM: double-buffered input windows + allowance for
    # full-tile f32 temporaries + slack.  Never request all of v7x's 64 MiB.
    in_tile_bytes = block_rows * LANE * (
        np.dtype(y_pr.dtype).itemsize + np.dtype(y_gt.dtype).itemsize)
    f32_tile_bytes = block_rows * LANE * 4
    vmem_limit = int(min(max(2 * in_tile_bytes + 8 * f32_tile_bytes + (2 << 20),
                             16 << 20),
                         48 << 20))

    out = pl.pallas_call(
        _make_kernel(n, eps, beta, block_rows, grid_n, tail_rem),
        out_shape=jax.ShapeDtypeStruct((1, 1), jnp.float32),
        grid_spec=pltpu.PrefetchScalarGridSpec(
            num_scalar_prefetch=0,
            grid=(grid_n,),
            in_specs=[
                pl.BlockSpec((block_rows, LANE), lambda i: (i, 0)),
                pl.BlockSpec((block_rows, LANE), lambda i: (i, 0)),
            ],
            out_specs=pl.BlockSpec((1, 1), lambda i: (0, 0)),
            # vreg-sized accumulator: 4 partial-sum planes of (8, 128) f32.
            scratch_shapes=[pltpu.VMEM((4, 8, LANE), jnp.float32)],
        ),
        compiler_params=pltpu.CompilerParams(
            dimension_semantics=("arbitrary",),
            vmem_limit_bytes=vmem_limit,
        ),
    )(x, g)
    return out[0, 0]


def _reference(y_pr, y_gt, eps=1e-7, beta=1.0):
    """Pure-JAX reference mirroring nn.BCEWithLogitsLoss + smp f_score."""
    x = y_pr.astype(jnp.float32)
    g = y_gt.astype(jnp.float32)
    bce = jnp.mean(jnp.maximum(x, 0.0) - x * g + jnp.log1p(jnp.exp(-jnp.abs(x))))
    p = jax.nn.sigmoid(x)
    tp = jnp.sum(g * p)
    fp = jnp.sum(p) - tp
    fn = jnp.sum(g) - tp
    b2 = beta ** 2
    score = ((1 + b2) * tp + eps) / ((1 + b2) * tp + b2 * fn + fp + eps)
    return (1.0 - score) + bce


if __name__ == "__main__":
    key = jax.random.PRNGKey(0)
    k1, k2 = jax.random.split(key)
    # NCHW, matching the PyTorch module's expected conv-style inputs.
    y_pr = jax.random.normal(k1, (2, 4, 16, 16), dtype=jnp.float32)  # logits
    y_gt = (jax.random.uniform(k2, (2, 4, 16, 16)) > 0.5).astype(jnp.float32)

    loss = jax.block_until_ready(bce_dice_loss(y_pr, y_gt))
    ref = jax.block_until_ready(_reference(y_pr, y_gt))

    if not np.allclose(np.asarray(loss), np.asarray(ref), rtol=1e-5, atol=1e-5):
        raise AssertionError(f"mismatch: pallas={loss} ref={ref}")

    print("KERNEL_OK")
</pallas_src>

<mosaic_0001>
module attributes {stable_mosaic.version = 11 : i64} {
  func.func @kernel(%arg0: i32, %arg1: memref<16x128xf32, #tpu.memory_space<vmem>>, %arg2: memref<16x128xf32, #tpu.memory_space<vmem>>, %arg3: memref<1x1xf32, #tpu.memory_space<vmem>>, %arg4: memref<4x8x128xf32, #tpu.memory_space<vmem>>) attributes {dimension_semantics = [#tpu.dimension_semantics<arbitrary>], iteration_bounds = array<i64: 1>, scalar_prefetch = 0 : i64, scratch_operands = 1 : i64, tpu.core_type = #tpu.core_type<tc>, window_params = [{transform_indices = @transform_0, window_bounds = array<i64: 16, 128>}, {transform_indices = @transform_1, window_bounds = array<i64: 16, 128>}, {pipeline_mode = #tpu.pipeline_mode<synchronous>, transform_indices = @transform_2, window_bounds = array<i64: 1, 1>}]} {
    %c0 = arith.constant 0 : index
    %c0_0 = arith.constant 0 : index
    %0 = vector.load %arg1[%c0, %c0_0] : memref<16x128xf32, #tpu.memory_space<vmem>>, vector<16x128xf32>
    %c0_1 = arith.constant 0 : index
    %c0_2 = arith.constant 0 : index
    %1 = vector.load %arg2[%c0_1, %c0_2] : memref<16x128xf32, #tpu.memory_space<vmem>>, vector<16x128xf32>
    %2 = math.absf %0 : vector<16x128xf32>
    %cst = arith.constant 0.000000e+00 : f32
    %3 = vector.broadcast %cst : f32 to vector<16x128xf32>
    %4 = arith.subf %3, %2 : vector<16x128xf32>
    %5 = math.exp %4 : vector<16x128xf32>
    %cst_3 = arith.constant 0.000000e+00 : f32
    %6 = vector.broadcast %cst_3 : f32 to vector<16x128xf32>
    %7 = arith.maximumf %0, %6 : vector<16x128xf32>
    %8 = arith.mulf %0, %1 : vector<16x128xf32>
    %9 = arith.subf %7, %8 : vector<16x128xf32>
    %10 = math.log1p %5 : vector<16x128xf32>
    %11 = arith.addf %9, %10 : vector<16x128xf32>
    %cst_4 = arith.constant 1.000000e+00 : f32
    %12 = vector.broadcast %cst_4 : f32 to vector<16x128xf32>
    %13 = arith.addf %12, %5 : vector<16x128xf32>
    %cst_5 = arith.constant 1.000000e+00 : f32
    %14 = vector.broadcast %cst_5 : f32 to vector<16x128xf32>
    %15 = arith.divf %14, %13 : vector<16x128xf32>
    %cst_6 = arith.constant 0.000000e+00 : f32
    %16 = vector.broadcast %cst_6 : f32 to vector<16x128xf32>
    %17 = arith.cmpf oge, %0, %16 : vector<16x128xf32>
    %18 = arith.mulf %5, %15 : vector<16x128xf32>
    %19 = arith.select %17, %15, %18 : vector<16x128xi1>, vector<16x128xf32>
    %20 = vector.shape_cast %11 : vector<16x128xf32> to vector<1x16x128xf32>
    %cst_7 = arith.constant dense<0.000000e+00> : vector<1xf32>
    %21 = vector.multi_reduction <add>, %20, %cst_7 [1, 2] : vector<1x16x128xf32> to vector<1xf32>
    %22 = vector.shape_cast %21 : vector<1xf32> to vector<1x1x1xf32>
    %23 = vector.extract %22[0, 0, 0] : f32 from vector<1x1x1xf32>
    %24 = vector.shape_cast %19 : vector<16x128xf32> to vector<1x16x128xf32>
    %cst_8 = arith.constant dense<0.000000e+00> : vector<1xf32>
    %25 = vector.multi_reduction <add>, %24, %cst_8 [1, 2] : vector<1x16x128xf32> to vector<1xf32>
    %26 = vector.shape_cast %25 : vector<1xf32> to vector<1x1x1xf32>
    %27 = vector.extract %26[0, 0, 0] : f32 from vector<1x1x1xf32>
    %28 = vector.shape_cast %1 : vector<16x128xf32> to vector<1x16x128xf32>
    %cst_9 = arith.constant dense<0.000000e+00> : vector<1xf32>
    %29 = vector.multi_reduction <add>, %28, %cst_9 [1, 2] : vector<1x16x128xf32> to vector<1xf32>
    %30 = vector.shape_cast %29 : vector<1xf32> to vector<1x1x1xf32>
    %31 = vector.extract %30[0, 0, 0] : f32 from vector<1x1x1xf32>
    %32 = arith.mulf %19, %1 : vector<16x128xf32>
    %33 = vector.shape_cast %32 : vector<16x128xf32> to vector<1x16x128xf32>
    %cst_10 = arith.constant dense<0.000000e+00> : vector<1xf32>
    %34 = vector.multi_reduction <add>, %33, %cst_10 [1, 2] : vector<1x16x128xf32> to vector<1xf32>
    %35 = vector.shape_cast %34 : vector<1xf32> to vector<1x1x1xf32>
    %36 = vector.extract %35[0, 0, 0] : f32 from vector<1x1x1xf32>
    %cst_11 = arith.constant 2.048000e+03 : f32
    %37 = arith.divf %23, %cst_11 : f32
    %38 = arith.subf %27, %36 : f32
    %39 = arith.subf %31, %36 : f32
    %cst_12 = arith.constant 2.000000e+00 : f32
    %40 = arith.mulf %cst_12, %36 : f32
    %cst_13 = arith.constant 1.000000e-07 : f32
    %41 = arith.addf %40, %cst_13 : f32
    %cst_14 = arith.constant 2.000000e+00 : f32
    %42 = arith.mulf %cst_14, %36 : f32
    %cst_15 = arith.constant 1.000000e+00 : f32
    %43 = arith.mulf %cst_15, %39 : f32
    %44 = arith.addf %42, %43 : f32
    %45 = arith.addf %44, %38 : f32
    %cst_16 = arith.constant 1.000000e-07 : f32
    %46 = arith.addf %45, %cst_16 : f32
    %47 = arith.divf %41, %46 : f32
    %cst_17 = arith.constant 1.000000e+00 : f32
    %48 = arith.subf %cst_17, %47 : f32
    %49 = arith.addf %48, %37 : f32
    %50 = vector.broadcast %49 : f32 to vector<1x1xf32>
    %c0_18 = arith.constant 0 : index
    %c0_19 = arith.constant 0 : index
    %51 = vector.load %arg3[%c0_18, %c0_19] : memref<1x1xf32, #tpu.memory_space<vmem>>, vector<1x1xf32>
    tpu.vector_store %arg3[%c0_18, %c0_19], %50 {strides = array<i32>} : memref<1x1xf32, #tpu.memory_space<vmem>>, vector<1x1xf32>,
    return
  }
  func.func @transform_0(%arg0: i32) -> (i32, i32) {
    %c0_i32 = arith.constant 0 : i32
    %c0_i32_0 = arith.constant 0 : i32
    return %arg0, %c0_i32 : i32, i32
  }
  func.func @transform_1(%arg0: i32) -> (i32, i32) {
    %c0_i32 = arith.constant 0 : i32
    %c0_i32_0 = arith.constant 0 : i32
    return %arg0, %c0_i32 : i32, i32
  }
  func.func @transform_2(%arg0: i32) -> (i32, i32) {
    %c0_i32 = arith.constant 0 : i32
    %c0_i32_0 = arith.constant 0 : i32
    %c0_i32_1 = arith.constant 0 : i32
    return %c0_i32, %c0_i32_0 : i32, i32
  }
}

</mosaic_0001>

<bundles_post_ra>
// kernel: tpu_custom_call.1
= control target key start
LH: loop header
LB: loop body
LE: loop exit
PB: predicated region body
PF: predicated region fallthrough
CT: control target
= control target key end

     0   :  { %7 = vsyncpa [#allocation4], 0  ;;  %s400_s0 = inlined_call_operand.hbm [shape: f32[16,128], index: 0, kind: input, shape index: {}]   ;;  %s401_s1 = inlined_call_operand.hbm [shape: f32[16,128], index: 1, kind: input, shape index: {}]   ;;  %s402_s2 = inlined_call_operand.hbm [shape: f32[1,1], index: 2, kind: output, shape index: {}]  }
   0x1   :  { %8 = vsyncpa [#allocation7], 0 }
   0x2   :  { %9 = vsyncpa [#allocation5], 0  ;;  %s14_s11 = sshll.u32 %s400_s0, 4  ;;  %s330_s12 = smov [#allocation3]   ;;  %s15_s11 = int_to_ptr.hbm [resolvable:$true] %s14_s11 }
   0x3   :  { %s16_s13 = sshll.u32 %s330_s12, 4  ;;  %s27_s16 = sshll.u32 %s401_s1, 4  ;;  %s17_s13 = int_to_ptr.vmem [resolvable:$true] %s16_s13  ;;  %s28_s16 = int_to_ptr.hbm [resolvable:$true] %s27_s16 }
   0x4   :  { %s331_s17 = smov 128   ;;  %s332_s18 = smov 8  }
   0x5   :  { %22 = dma.hbm_to_vmem [thread:$0]  %s15_s11, 256, %s17_s13, [#allocation4], %s331_s17, %s331_s17, %s332_s18  }
   0x6   :  { %s333_s19 = smov [#allocation6]  }
   0x7   :  { %s29_s20 = sshll.u32 %s333_s19, 4  ;;  %s30_s20 = int_to_ptr.vmem [resolvable:$true] %s29_s20 }
   0x8   :  { %35 = dma.hbm_to_vmem [thread:$0]  %s28_s16, 256, %s30_s20, [#allocation7], %s331_s17, %s331_s17, %s332_s18  }
   0x9   :  { %324 = dma.done.wait [#allocation4], 256  }
   0xa   :  { %325 = vsyncadd [#allocation4], 4294967040 }
   0xb   :  { %326 = dma.done.wait [#allocation7], 256  }
   0xc   :  { %327 = vsyncadd [#allocation7], 4294967040  ;;  %v357_v0 = vld [vmem:[#allocation6] sm:$0xff]  ;;  %v359_v1 = vld [vmem:[#allocation6 + $0x8] sm:$0xff]  ;;  %s335_s5 = smov [#allocation8]   ;;  %s207_s9 = sshll.u32 %s402_s2, 4  ;;  %s208_s9 = int_to_ptr.hbm [resolvable:$true] %s207_s9 }
   0xd   :  { %v361_v2 = vld [vmem:[#allocation3] sm:$0xff]  ;;  %v140_v3 = vadd.f32 %v359_v1, %v357_v0  ;;  %v365_v4 = vld [vmem:[#allocation3 + $0x8] sm:$0xff]  ;;  %s205_s6 = sshll.u32 %s335_s5, 4  ;;  %s206_s6 = int_to_ptr.vmem [resolvable:$true] %s205_s6 }
   0xe   :  { %v48_v5 = vand.u32 2147483647, %v361_v2  ;;  %v49_v6 = vand.u32 2147483647, %v365_v4  ;;  %v58_v17 = vmul.f32 %v357_v0, %v361_v2  ;;  %v56_v19 = vmax.f32 %v361_v2, 0.0 }
   0xf   :  { %141 = vadd.xlane.f32.xlu1 %v140_v3  ;;  %v59_v22 = vmul.f32 %v359_v1, %v365_v4  ;;  %v57_v23 = vmax.f32 %v365_v4, 0.0  ;;  %vm114_vm10 = vcmp.ge.f32.partialorder %v361_v2, 0.0  ;;  %vm115_vm11 = vcmp.ge.f32.partialorder %v365_v4, 0.0 }
  0x10   :  { %v50_v7 = vsub.f32 0.0, %v48_v5  ;;  %v51_v8 = vsub.f32 0.0, %v49_v6  ;;  %v60_v27 = vsub.f32 %v56_v19, %v58_v17  ;;  %v334_v6 = vmov 2048.0  }
  0x11   :  { %v61_v30 = vsub.f32 %v57_v23, %v59_v22 }
  0x12   :  { %v52_v9 = vmul.f32 1.442695, %v50_v7  ;;  %v54_v10 = vmul.f32 1.442695, %v51_v8 }
  0x14   :  { %236 = vpow2.f32 %v52_v9 }
  0x15   :  { %238 = vpow2.f32 %v54_v10 }
  0x1a   :  { %v369_v11 = vpop.eup %236 }
  0x1b   :  { %v371_v12 = vpop.eup %238  ;;  %v62_v13 = vadd.f32 1.0, %v369_v11  ;;  %v65_v14 = vmul.f32 -0.5, %v369_v11  ;;  %v68_v20 = vand.u32 2147483647, %v369_v11 }
  0x1c   :  { %v71_v15 = vadd.f32 1.0, %v371_v12  ;;  %v74_v16 = vmul.f32 -0.5, %v371_v12  ;;  %v77_v24 = vand.u32 2147483647, %v371_v12 }
  0x1d   :  { %240 = vlog2.f32 %v62_v13  ;;  %v66_v18 = vadd.f32 1.0, %v65_v14  ;;  %vm69_vm0 = vcmp.lt.f32.partialorder %v68_v20, 0.0004427343  ;;  %vm89_vm2 = vweird.f32 %v62_v13 }
  0x1e   :  { %242 = vlog2.f32 %v71_v15  ;;  %v75_v21 = vadd.f32 1.0, %v74_v16  ;;  %vm78_vm1 = vcmp.lt.f32.partialorder %v77_v24, 0.0004427343  ;;  %v93_v37 = vand.u32 2147483647, %v62_v13 }
  0x1f   :  { %244 = vrcp.f32 %v62_v13  ;;  %v67_v25 = vmul.f32 %v369_v11, %v66_v18  ;;  %v95_v40 = vand.u32 2147483648, %v62_v13  ;;  %v110_v44 = vand.u32 2147483648, %v71_v15 }
  0x20   :  { %246 = vrcp.f32 %v71_v15  ;;  %v76_v28 = vmul.f32 %v371_v12, %v75_v21  ;;  %vm104_vm4 = vweird.f32 %v71_v15  ;;  %v108_v46 = vand.u32 2147483647, %v71_v15 }
  0x21   :  { %v96_v49 = vor.u32 1.1754944e-38, %v95_v40  ;;  %vm94_vm7 = vcmp.eq.f32.partialorder %v93_v37, 8.507059e+37  ;;  %v111_v52 = vor.u32 1.1754944e-38, %v110_v44  ;;  %248 = vrcp.f32 %v334_v6 }
  0x22   :  { %vm109_vm9 = vcmp.eq.f32.partialorder %v108_v46, 8.507059e+37 }
  0x23   :  { %v241_v26 = vpop.eup %240 }
  0x24   :  { %v243_v29 = vpop.eup %242  ;;  %v64_v31 = vmul.f32 0.6931472, %v241_v26 }
  0x25   :  { %v245_v32 = vpop.eup %244  ;;  %v73_v33 = vmul.f32 0.6931472, %v243_v29 }
  0x26   :  { %v247_v34 = vpop.eup %246  ;;  %v70_v35 = vsel %vm69_vm0, %v67_v25, %v64_v31  ;;  %v85_v36 = vmul.f32 %v245_v32, %v62_v13  ;;  %vm90_vm3 = vweird.f32 %v245_v32 }
  0x27   :  { %v79_v38 = vsel %vm78_vm1, %v76_v28, %v73_v33  ;;  %v80_v39 = vadd.f32 %v70_v35, %v60_v27  ;;  %v100_v41 = vmul.f32 %v247_v34, %v71_v15  ;;  %vm105_vm5 = vweird.f32 %v247_v34  ;;  %vm91_vm6 = vmor %vm89_vm2, %vm90_vm3  ;;  %v249_v10 = vpop.eup %248 }
  0x28   :  { %v81_v42 = vadd.f32 %v79_v38, %v61_v30  ;;  %v86_v43 = vsub.f32 1.0, %v85_v36  ;;  %vm106_vm8 = vmor %vm104_vm4, %vm105_vm5  ;;  %v163_v14 = vmul.f32 2048.0, %v249_v10  ;;  %vm167_vm12 = vweird.f32 %v249_v10 }
  0x29   :  { %v101_v45 = vsub.f32 1.0, %v100_v41  ;;  %vm198_vm1 = vcmask 0  }
  0x2a   :  { %v120_v47 = vadd.f32 %v81_v42, %v80_v39  ;;  %v87_v48 = vmul.f32 %v245_v32, %v86_v43  ;;  %v164_v18 = vsub.f32 1.0, %v163_v14 }
  0x2b   :  { %v102_v50 = vmul.f32 %v247_v34, %v101_v45 }
  0x2c   :  { %121 = vadd.xlane.f32.xlu0 %v120_v47  ;;  %v88_v51 = vadd.f32 %v245_v32, %v87_v48  ;;  %v165_v25 = vmul.f32 %v249_v10, %v164_v18 }
  0x2d   :  { %v103_v53 = vadd.f32 %v247_v34, %v102_v50 }
  0x2e   :  { %v92_v54 = vsel %vm91_vm6, %v245_v32, %v88_v51  ;;  %v166_v31 = vadd.f32 %v249_v10, %v165_v25 }
  0x2f   :  { %v97_v55 = vsel %vm94_vm7, %v96_v49, %v92_v54  ;;  %v107_v56 = vsel %vm106_vm8, %v247_v34, %v103_v53 }
  0x30   :  { %v112_v57 = vsel %vm109_vm9, %v111_v52, %v107_v56  ;;  %v116_v58 = vmul.f32 %v369_v11, %v97_v55  ;;  %v168_v36 = vsel %vm167_vm12, %v249_v10, %v166_v31 }
  0x31   :  { %v117_v59 = vmul.f32 %v371_v12, %v112_v57 }
  0x32   :  { %v118_v60 = vsel %vm114_vm10, %v97_v55, %v116_v58 }
  0x33   :  { %v119_v61 = vsel %vm115_vm11, %v112_v57, %v117_v59  ;;  %v150_v62 = vmul.f32 %v118_v60, %v357_v0 }
  0x34   :  { %v130_v63 = vadd.f32 %v119_v61, %v118_v60  ;;  %v151_v3 = vmul.f32 %v119_v61, %v359_v1 }
  0x36   :  { %131 = vadd.xlane.f32.xlu0 %v130_v63  ;;  %v152_v5 = vadd.f32 %v151_v3, %v150_v62 }
  0x38   :  { %153 = vadd.xlane.f32.xlu1 %v152_v5 }
  0x82   :  { %v142_v2 = vpop.xlane.xlu1 %141 }
  0x83   :  { %v143_v4 = vrot.slane %v142_v2, 4 }
  0x85   :  { %v144_v12 = vadd.f32 %v143_v4, %v142_v2 }
  0x87   :  { %v145_v0 = vrot.slane %v144_v12, 2 }
  0x89   :  { %v146_v22 = vadd.f32 %v145_v0, %v144_v12 }
  0x8b   :  { %v147_v28 = vrot.slane %v146_v22, 1 }
  0x8d   :  { %v148_v34 = vadd.f32 %v147_v28, %v146_v22 }
  0x9f   :  { %v122_v7 = vpop.xlane.xlu0 %121 }
  0xa0   :  { %v123_v8 = vrot.slane %v122_v7, 4 }
  0xa2   :  { %v124_v9 = vadd.f32 %v123_v8, %v122_v7 }
  0xa4   :  { %v125_v11 = vrot.slane %v124_v9, 2 }
  0xa6   :  { %v126_v13 = vadd.f32 %v125_v11, %v124_v9 }
  0xa8   :  { %v127_v15 = vrot.slane %v126_v13, 1 }
  0xa9   :  { %v132_v16 = vpop.xlane.xlu0 %131 }
  0xaa   :  { %v133_v17 = vrot.slane %v132_v16, 4  ;;  %v128_v1 = vadd.f32 %v127_v15, %v126_v13 }
  0xab   :  { %v154_v19 = vpop.xlane.xlu1 %153 }
  0xac   :  { %v134_v20 = vadd.f32 %v133_v17, %v132_v16  ;;  %v155_v21 = vrot.slane %v154_v19, 4  ;;  %218 = vpush %v128_v1 }
  0xae   :  { %v135_v23 = vrot.slane %v134_v20, 2  ;;  %v156_v24 = vadd.f32 %v155_v21, %v154_v19 }
  0xb0   :  { %v136_v26 = vadd.f32 %v135_v23, %v134_v20  ;;  %v157_v27 = vrot.slane %v156_v24, 2 }
  0xb2   :  { %v158_v29 = vadd.f32 %v157_v27, %v156_v24  ;;  %v137_v30 = vrot.slane %v136_v26, 1 }
  0xb4   :  { %v138_v32 = vadd.f32 %v137_v30, %v136_v26  ;;  %v159_v33 = vrot.slane %v158_v29, 1 }
  0xb6   :  { %220 = vpush %v138_v32  ;;  %v160_v35 = vadd.f32 %v159_v33, %v158_v29 }
  0xb7   :  { %222 = vpush %v148_v34 }
  0xb8   :  { %224 = vpush %v160_v35 }
  0xb9   :  { %226 = vpush %v168_v36 }
  0xdd   :  { %s394_s0 = spop %218 }
  0xe7   :  { %s221_s1 = spop %220 }
  0xe8   :  { %s223_s21 = spop %222 }
  0xe9   :  { %s225_s22 = spop %224 }
  0xea   :  { %s173_s23 = smul.f32 2.0, %s225_s22  ;;  %s172_s24 = ssub.f32 %s223_s21, %s225_s22 }
  0xeb   :  { %s171_s25 = ssub.f32 %s221_s1, %s225_s22  ;;  %s227_s29 = spop %226 }
  0xec   :  { %s175_s26 = sadd.f32 %s173_s23, %s172_s24  ;;  %s170_s10 = smul.f32 %s227_s29, %s394_s0 }
  0xed   :  { %s174_s30 = sadd.f32 1e-07, %s173_s23 }
  0xee   :  { %s176_s27 = sadd.f32 %s175_s26, %s171_s25 }
  0xf0   :  { %s177_s28 = sadd.f32 1e-07, %s176_s27 }
  0xf2   :  { %v178_v37 = vstv %s177_s28 }
  0xf3   :  { %250 = vrcp.f32 %v178_v37  ;;  %v190_v41 = vand.u32 2147483648, %v178_v37  ;;  %v188_v43 = vand.u32 2147483647, %v178_v37  ;;  %vm184_vm14 = vweird.f32 %v178_v37 }
  0xf5   :  { %v191_v45 = vor.u32 1.1754944e-38, %v190_v41  ;;  %vm189_vm0 = vcmp.eq.f32.partialorder %v188_v43, 8.507059e+37 }
  0xf9   :  { %v251_v38 = vpop.eup %250 }
  0xfa   :  { %v180_v39 = vmul.f32 %v251_v38, %v178_v37  ;;  %vm185_vm13 = vweird.f32 %v251_v38 }
  0xfb   :  { %vm186_vm15 = vmor %vm184_vm14, %vm185_vm13 }
  0xfc   :  { %v181_v40 = vsub.f32 1.0, %v180_v39 }
  0xfe   :  { %v182_v42 = vmul.f32 %v251_v38, %v181_v40 }
 0x100   :  { %v183_v44 = vadd.f32 %v251_v38, %v182_v42 }
 0x102   :  { %v187_v46 = vsel %vm186_vm15, %v251_v38, %v183_v44 }
 0x103   :  { %v192_v47 = vsel %vm189_vm0, %v191_v45, %v187_v46 }
 0x104   :  { %228 = vpush %v192_v47 }
 0x135   :  { %s229_s3 = spop %228 }
 0x136   :  { %s194_s4 = smul.f32 %s229_s3, %s174_s30 }
 0x138   :  { %s195_s11 = ssub.f32 1.0, %s194_s4 }
 0x13a   :  { %s196_s12 = sadd.f32 %s195_s11, %s170_s10 }
 0x13c   :  { %v197_v48 = vstv %s196_s12 }
 0x13d   :  { %199 = vst.msk [vmem:[#allocation8] sm:$0x1] %vm198_vm1, %v197_v48 }
 0x13e   :  { %210 = dma.vmem_to_hbm [thread:$0]  %s206_s6, 16, %s208_s9, [#allocation5]  }
 0x13f   :  { %328 = dma.done.wait [#allocation5], 16  }
 0x140   :  { %329 = vsyncadd [#allocation5], 4294967280 }
 0x141   :  { %215 = vsyncpa [#allocation4], 1 }
 0x142   :  { %216 = vsyncpa [#allocation7], 1 }
 0x143   :  { %217 = vsyncpa [#allocation5], 1 }

</bundles_post_ra>
